<compile_context>
chip_gen: v6e
topology: v6e:2x2x1
jax: 0.10.0
libtpu: 0.0.40
codegen_flags: <defaults>
</compile_context>

<pallas_src>
import functools

import jax
import jax.numpy as jnp
from jax.experimental import pallas as pl
from jax.experimental.pallas import tpu as pltpu

LANE = 128
SUBLANE = 8


def _round_up(n, m):
    return ((n + m - 1) // m) * m


def _fcdqn_kernel(x_ref, w1_ref, b1_ref, w2_ref, b2_ref, out_ref):
    # hidden = relu(x @ W1 + b1); q = hidden @ W2 + b2   (all f32 accumulation)
    x = x_ref[...]                                                    # (TB, n_states)
    h = jnp.dot(x, w1_ref[...], preferred_element_type=jnp.float32)   # (TB, Hp)
    h = jnp.maximum(h + b1_ref[...], 0.0)
    q = jnp.dot(h, w2_ref[...], preferred_element_type=jnp.float32)   # (TB, Ap)
    out_ref[...] = (q + b2_ref[...]).astype(out_ref.dtype)


def pad_fcdqn_params(w1, b1, w2, b2):
    """Zero-pad hidden / action dims to lane multiples ONCE (exact)."""
    n_states, hidden = w1.shape
    n_actions = w2.shape[1]
    Hp = _round_up(hidden, LANE)       # 50 -> 128
    Ap = _round_up(n_actions, LANE)    # 4  -> 128
    w1p = jnp.pad(w1.astype(jnp.float32), ((0, 0), (0, Hp - hidden)))
    b1p = jnp.pad(b1.astype(jnp.float32).reshape(1, hidden),
                  ((0, 0), (0, Hp - hidden)))
    w2p = jnp.pad(w2.astype(jnp.float32),
                  ((0, Hp - hidden), (0, Ap - n_actions)))
    b2p = jnp.pad(b2.astype(jnp.float32).reshape(1, n_actions),
                  ((0, 0), (0, Ap - n_actions)))
    return (w1p, b1p, w2p, b2p), n_actions


@functools.partial(jax.jit, static_argnames=("n_actions", "block_b"))
def fcdqn_forward_padded(x, w1p, b1p, w2p, b2p, *, n_actions, block_b=512):
    """x: (B, n_states); padded params from pad_fcdqn_params.
       Returns (B, n_actions) float32."""
    x = x.astype(jnp.float32)
    B, n_states = x.shape
    Hp = w1p.shape[1]
    Ap = w2p.shape[1]

    # Batch tiling: rows padded to a sublane multiple; padded rows are sliced
    # off after the kernel (their values are irrelevant).
    TB = min(block_b, _round_up(B, SUBLANE))
    Bp = _round_up(B, TB)
    xp = x if Bp == B else jnp.pad(x, ((0, Bp - B), (0, 0)))
    n_tiles = Bp // TB

    out_shape = jax.ShapeDtypeStruct((Bp, Ap), jnp.float32)

    if n_tiles == 1:
        # Tiny-batch fast path: no grid, no software pipeline — every operand
        # is a whole-array VMEM block.
        q = pl.pallas_call(
            _fcdqn_kernel,
            out_shape=out_shape,
            in_specs=[pl.BlockSpec(memory_space=pltpu.MemorySpace.VMEM)] * 5,
            out_specs=pl.BlockSpec(memory_space=pltpu.MemorySpace.VMEM),
        )(xp, w1p, b1p, w2p, b2p)
    else:
        # Batch-tiled path: grid over rows; weights / biases stay VMEM-resident
        # (constant index_maps); batch axis parallel for v7x megacore.
        q = pl.pallas_call(
            _fcdqn_kernel,
            out_shape=out_shape,
            grid_spec=pltpu.PrefetchScalarGridSpec(
                num_scalar_prefetch=0,
                grid=(n_tiles,),
                in_specs=[
                    pl.BlockSpec((TB, n_states), lambda i: (i, 0)),
                    pl.BlockSpec((n_states, Hp), lambda i: (0, 0)),
                    pl.BlockSpec((1, Hp), lambda i: (0, 0)),
                    pl.BlockSpec((Hp, Ap), lambda i: (0, 0)),
                    pl.BlockSpec((1, Ap), lambda i: (0, 0)),
                ],
                out_specs=pl.BlockSpec((TB, Ap), lambda i: (i, 0)),
            ),
            compiler_params=pltpu.CompilerParams(
                dimension_semantics=("parallel",)),
        )(xp, w1p, b1p, w2p, b2p)

    return q[:B, :n_actions]


def fcdqn_forward(x, w1, b1, w2, b2, *, block_b=512):
    """Convenience wrapper matching the raw PyTorch parameter shapes."""
    padded, n_actions = pad_fcdqn_params(w1, b1, w2, b2)
    return fcdqn_forward_padded(x, *padded, n_actions=n_actions,
                                block_b=block_b)


def init_fcdqn_params(key, n_states, n_actions, hidden=50):
    """Mirror the PyTorch module init: weights ~ N(0, 0.1), biases ~ PyTorch
       Linear default U(-1/sqrt(fan_in), 1/sqrt(fan_in))."""
    k1, k2, k3, k4 = jax.random.split(key, 4)
    w1 = 0.1 * jax.random.normal(k1, (n_states, hidden), jnp.float32)
    b1 = jax.random.uniform(k2, (1, hidden), jnp.float32,
                            minval=-1.0 / jnp.sqrt(n_states),
                            maxval=1.0 / jnp.sqrt(n_states))
    w2 = 0.1 * jax.random.normal(k3, (hidden, n_actions), jnp.float32)
    b2 = jax.random.uniform(k4, (1, n_actions), jnp.float32,
                            minval=-1.0 / jnp.sqrt(hidden),
                            maxval=1.0 / jnp.sqrt(hidden))
    return w1, b1, w2, b2


def _reference(x, w1, b1, w2, b2):
    return jnp.maximum(x @ w1 + b1, 0.0) @ w2 + b2


if __name__ == "__main__":
    n_states, n_actions = 16, 4

    key = jax.random.PRNGKey(0)
    kx_small, kx_big, kp = jax.random.split(key, 3)
    w1, b1, w2, b2 = init_fcdqn_params(kp, n_states, n_actions)
    padded, _ = pad_fcdqn_params(w1, b1, w2, b2)

    # 1) Tiny batch (DQN env-step style) -> no-grid fast path.
    x_small = jax.random.normal(kx_small, (8, n_states), jnp.float32)
    q_small = fcdqn_forward_padded(x_small, *padded, n_actions=n_actions)
    jax.block_until_ready(q_small)
    ref_small = _reference(x_small, w1, b1, w2, b2)
    assert q_small.shape == (8, n_actions)
    assert jnp.allclose(q_small, ref_small, atol=1e-4, rtol=1e-4)

    # 2) Replay-minibatch style batch -> batch-tiled, parallel-grid path.
    x_big = jax.random.normal(kx_big, (1024, n_states), jnp.float32)
    q_big = fcdqn_forward_padded(x_big, *padded, n_actions=n_actions,
                                 block_b=256)
    jax.block_until_ready(q_big)
    ref_big = _reference(x_big, w1, b1, w2, b2)
    assert q_big.shape == (1024, n_actions)
    assert jnp.allclose(q_big, ref_big, atol=1e-4, rtol=1e-4)

    print("KERNEL_OK")
</pallas_src>

<mosaic_0001>
module attributes {stable_mosaic.version = 11 : i64} {
  func.func @_fcdqn_kernel(%arg0: memref<8x16xf32, #tpu.memory_space<vmem>>, %arg1: memref<16x128xf32, #tpu.memory_space<vmem>>, %arg2: memref<1x128xf32, #tpu.memory_space<vmem>>, %arg3: memref<128x128xf32, #tpu.memory_space<vmem>>, %arg4: memref<1x128xf32, #tpu.memory_space<vmem>>, %arg5: memref<8x128xf32, #tpu.memory_space<vmem>>) attributes {dimension_semantics = [], scalar_prefetch = 0 : i64, scratch_operands = 0 : i64, tpu.core_type = #tpu.core_type<tc>} {
    %c0 = arith.constant 0 : index
    %c0_0 = arith.constant 0 : index
    %0 = vector.load %arg0[%c0, %c0_0] : memref<8x16xf32, #tpu.memory_space<vmem>>, vector<8x16xf32>
    %c0_1 = arith.constant 0 : index
    %c0_2 = arith.constant 0 : index
    %1 = vector.load %arg1[%c0_1, %c0_2] : memref<16x128xf32, #tpu.memory_space<vmem>>, vector<16x128xf32>
    %cst = arith.constant dense<0.000000e+00> : vector<8x128xf32>
    %2 = tpu.matmul %0, %1, %cst {dimension_numbers = #tpu.dot_dimension_numbers<[1], [0], [0], [1], [0, 0, 1, 1], [], []>} : vector<8x16xf32>, vector<16x128xf32>, vector<8x128xf32> -> vector<8x128xf32>
    %c0_3 = arith.constant 0 : index
    %c0_4 = arith.constant 0 : index
    %3 = vector.load %arg2[%c0_3, %c0_4] : memref<1x128xf32, #tpu.memory_space<vmem>>, vector<1x128xf32>
    %4 = vector.broadcast %3 : vector<1x128xf32> to vector<8x128xf32>
    %5 = arith.addf %2, %4 : vector<8x128xf32>
    %cst_5 = arith.constant 0.000000e+00 : f32
    %6 = vector.broadcast %cst_5 : f32 to vector<8x128xf32>
    %7 = arith.maximumf %5, %6 : vector<8x128xf32>
    %c0_6 = arith.constant 0 : index
    %c0_7 = arith.constant 0 : index
    %8 = vector.load %arg3[%c0_6, %c0_7] : memref<128x128xf32, #tpu.memory_space<vmem>>, vector<128x128xf32>
    %cst_8 = arith.constant dense<0.000000e+00> : vector<8x128xf32>
    %9 = tpu.matmul %7, %8, %cst_8 {dimension_numbers = #tpu.dot_dimension_numbers<[1], [0], [0], [1], [0, 0, 1, 1], [], []>} : vector<8x128xf32>, vector<128x128xf32>, vector<8x128xf32> -> vector<8x128xf32>
    %c0_9 = arith.constant 0 : index
    %c0_10 = arith.constant 0 : index
    %10 = vector.load %arg4[%c0_9, %c0_10] : memref<1x128xf32, #tpu.memory_space<vmem>>, vector<1x128xf32>
    %11 = vector.broadcast %10 : vector<1x128xf32> to vector<8x128xf32>
    %12 = arith.addf %9, %11 : vector<8x128xf32>
    %c0_11 = arith.constant 0 : index
    %c0_12 = arith.constant 0 : index
    %13 = vector.load %arg5[%c0_11, %c0_12] : memref<8x128xf32, #tpu.memory_space<vmem>>, vector<8x128xf32>
    tpu.vector_store %arg5[%c0_11, %c0_12], %12 {strides = array<i32>} : memref<8x128xf32, #tpu.memory_space<vmem>>, vector<8x128xf32>,
    return
  }
}

</mosaic_0001>

<bundles_post_ra>
// kernel: fcdqn_forward_padded.1
= control target key start
LH: loop header
LB: loop body
LE: loop exit
PB: predicated region body
PF: predicated region fallthrough
CT: control target
= control target key end

     0   :  { %10 = vsyncpa [#allocation3], 0  ;;  %s435_s0 = inlined_call_operand.hbm [shape: f32[8,16], index: 0, kind: input, shape index: {}]   ;;  %s436_s1 = inlined_call_operand.hbm [shape: f32[16,128], index: 1, kind: input, shape index: {}]   ;;  %s437_s2 = inlined_call_operand.vmem [shape: f32[1,128], index: 2, kind: input, shape index: {}]   ;;  %s438_s3 = inlined_call_operand.hbm [shape: f32[128,128], index: 3, kind: input, shape index: {}]   ;;  %s439_s4 = inlined_call_operand.vmem [shape: f32[1,128], index: 4, kind: input, shape index: {}]   ;;  %s440_s5 = inlined_call_operand.vmem [shape: f32[8,128], index: 5, kind: output, shape index: {}]  }
   0x1   :  { %11 = vsyncpa [#allocation5], 0  ;;  %s380_s18 = smov [#allocation4]  }
   0x2   :  { %s27_s19 = sshll.u32 %s380_s18, 4  ;;  %s28_s19 = int_to_ptr.vmem [resolvable:$true] %s27_s19 }
   0x3   :  { %s324_s20 = scalar_lea.vmem %s28_s19, 256  ;;  %p329_p1 = scmp.lt.s32.totalorder %s28_s19, %s28_s19 }
   0x4   :  { %p325_p0 = scmp.ne.s32.totalorder %s28_s19, %s324_s20  ;;  %p330_p2 = scmp.lt.s32.totalorder %s324_s20, %s324_s20 }
   0x6   :  { %p331_p3 = por %p330_p2, %p329_p1 }
   0x8   :  { %p332_p4 = pnand %p331_p3, %p325_p0 }
   0xa   :  { %335 = shalt.err (!%p332_p4)
}
   0xb   :  { %s381_s21 = smov 128   ;;  %s382_s22 = smov 8  }
   0xc   :  { %33 = dma.hbm_to_vmem [thread:$0]  %s436_s1, 256, %s28_s19, [#allocation5], %s381_s21, %s381_s21, %s382_s22  }
   0xd   :  { %s383_s25 = smov [#allocation2]   ;;  %s384_s27 = smov [#allocation6]  }
   0xe   :  { %s18_s26 = sshll.u32 %s383_s25, 4  ;;  %s41_s28 = sshll.u32 %s384_s27, 4  ;;  %s19_s26 = int_to_ptr.vmem [resolvable:$true] %s18_s26  ;;  %s42_s28 = int_to_ptr.vmem [resolvable:$true] %s41_s28 }
   0xf   :  { %s344_s29 = scalar_lea.vmem %s19_s26, 128  ;;  %p349_p6 = scmp.lt.s32.totalorder %s19_s26, %s19_s26 }
  0x10   :  { %p345_p5 = scmp.ne.s32.totalorder %s19_s26, %s344_s29  ;;  %p350_p7 = scmp.lt.s32.totalorder %s344_s29, %s344_s29 }
  0x12   :  { %p351_p8 = por %p350_p7, %p349_p6 }
  0x14   :  { %p352_p9 = pnand %p351_p8, %p345_p5 }
  0x16   :  { %355 = shalt.err (!%p352_p9)
}
  0x17   :  { %21 = dma.hbm_to_vmem [thread:$0]  %s435_s0, 128, %s19_s26, [#allocation3]  }
  0x18   :  { %s364_s7 = scalar_lea.vmem %s42_s28, 2048  ;;  %p369_p11 = scmp.lt.s32.totalorder %s42_s28, %s42_s28 }
  0x19   :  { %p365_p10 = scmp.ne.s32.totalorder %s42_s28, %s364_s7  ;;  %p370_p12 = scmp.lt.s32.totalorder %s364_s7, %s364_s7 }
  0x1b   :  { %p371_p13 = por %p370_p12, %p369_p11 }
  0x1d   :  { %p372_p0 = pnand %p371_p13, %p365_p10 }
  0x1f   :  { %375 = shalt.err (!%p372_p0)
}
  0x20   :  { %47 = dma.hbm_to_vmem [thread:$0]  %s438_s3, 2048, %s42_s28, [#allocation5], %s381_s21, %s381_s21, %s382_s22  }
  0x21   :  { %376 = dma.done.wait [#allocation3], 128  }
  0x22   :  { %377 = vsyncadd [#allocation3], 4294967168 }
  0x23   :  { %378 = dma.done.wait [#allocation5], 2304  }
  0x24   :  { %379 = vsyncadd [#allocation5], 4294964992  ;;  %v385_v0 = vmov 0.0   ;;  %vm386_vm0 = vmmov 0   ;;  %v61_v1 = vld [vmem:[#allocation4 + $0x8] sm:$0xff]  ;;  %v60_v2 = vld [vmem:[#allocation4] sm:$0xff] }
  0x25   :  { %267 = vmatprep.subr.mxu0 %v385_v0  ;;  %271 = vmatprep.mubr.msk.f32.mxu0 %vm386_vm0, %v385_v0  ;;  %v59_v3 = vld [vmem:[#allocation2] sm:$0xff]  ;;  %vm69_vm1 = vcmask 130048   ;;  %v159_v4 = vld [vmem:[#allocation6 + $0x78] sm:$0xff]  ;;  %v158_v5 = vld [vmem:[#allocation6 + $0x70] sm:$0xff] }
  0x26   :  { %274 = vmatprep.subr.mxu1 %v385_v0  ;;  %306 = vmatprep.mubr.msk.f32.mxu1 %vm386_vm0, %v385_v0  ;;  %v157_v6 = vld [vmem:[#allocation6 + $0x68] sm:$0xff]  ;;  %v156_v7 = vld [vmem:[#allocation6 + $0x60] sm:$0xff]  ;;  %v155_v8 = vld [vmem:[#allocation6 + $0x58] sm:$0xff] }
  0x27   :  { %268 = vmatpush3.msra.mxu0 %v61_v1  ;;  %275 = vmatpush3.msra.mxu1 %v159_v4  ;;  %v154_v9 = vld [vmem:[#allocation6 + $0x50] sm:$0xff]  ;;  %v153_v10 = vld [vmem:[#allocation6 + $0x48] sm:$0xff]  ;;  %v152_v11 = vld [vmem:[#allocation6 + $0x40] sm:$0xff] }
  0x28   :  { %269 = vmatprep.subr.mxu0 %v385_v0  ;;  %276 = vmatprep.subr.mxu1 %v385_v0  ;;  %v151_v12 = vld [vmem:[#allocation6 + $0x38] sm:$0xff]  ;;  %v150_v13 = vld [vmem:[#allocation6 + $0x30] sm:$0xff]  ;;  %v149_v14 = vld [vmem:[#allocation6 + $0x28] sm:$0xff] }
  0x29   :  { %270 = vmatpush3.msra.mxu0 %v60_v2  ;;  %277 = vmatpush3.msra.mxu1 %v158_v5  ;;  %v148_v15 = vld [vmem:[#allocation6 + $0x20] sm:$0xff]  ;;  %v147_v16 = vld [vmem:[#allocation6 + $0x18] sm:$0xff]  ;;  %v146_v17 = vld [vmem:[#allocation6 + $0x10] sm:$0xff] }
  0x2a   :  { %272 = vmatmul.mubr.msk.f32.vlgmr.msra.gmra.mxu0 %vm69_vm1, %v59_v3  ;;  %278 = vmatprep.subr.mxu1 %v385_v0  ;;  %v145_v18 = vld [vmem:[#allocation6 + $0x8] sm:$0xff]  ;;  %v144_v19 = vld [vmem:[#allocation6] sm:$0xff] }
  0x2b   :  { %279 = vmatpush3.msra.mxu1 %v157_v6  ;;  %v244_v20 = vld [vmem:[%s437_s2] ss:$0 sm:$0xff] }
  0x2c   :  { %280 = vmatprep.subr.mxu1 %v385_v0  ;;  %v246_v25 = vld [vmem:[%s439_s4] ss:$0 sm:$0xff] }
  0x2d   :  { %281 = vmatpush3.msra.mxu1 %v156_v7 }
  0x2e   :  { %282 = vmatprep.subr.mxu1 %v385_v0 }
  0x2f   :  { %283 = vmatpush3.msra.mxu1 %v155_v8 }
  0x30   :  { %284 = vmatprep.subr.mxu1 %v385_v0 }
  0x31   :  { %285 = vmatpush3.msra.mxu1 %v154_v9 }
  0x32   :  { %286 = vmatprep.subr.mxu1 %v385_v0 }
  0x33   :  { %287 = vmatpush3.msra.mxu1 %v153_v10 }
  0x34   :  { %288 = vmatprep.subr.mxu1 %v385_v0 }
  0x35   :  { %289 = vmatpush3.msra.mxu1 %v152_v11 }
  0x36   :  { %290 = vmatprep.subr.mxu1 %v385_v0 }
  0x37   :  { %291 = vmatpush3.msra.mxu1 %v151_v12 }
  0x38   :  { %292 = vmatprep.subr.mxu1 %v385_v0 }
  0x39   :  { %293 = vmatpush3.msra.mxu1 %v150_v13 }
  0x3a   :  { %294 = vmatprep.subr.mxu1 %v385_v0 }
  0x3b   :  { %295 = vmatpush3.msra.mxu1 %v149_v14 }
  0x3c   :  { %296 = vmatprep.subr.mxu1 %v385_v0 }
  0x3d   :  { %297 = vmatpush3.msra.mxu1 %v148_v15 }
  0x3e   :  { %298 = vmatprep.subr.mxu1 %v385_v0 }
  0x3f   :  { %299 = vmatpush3.msra.mxu1 %v147_v16 }
  0x40   :  { %300 = vmatprep.subr.mxu1 %v385_v0 }
  0x41   :  { %301 = vmatpush3.msra.mxu1 %v146_v17 }
  0x42   :  { %302 = vmatprep.subr.mxu1 %v385_v0 }
  0x43   :  { %303 = vmatpush3.msra.mxu1 %v145_v18 }
  0x44   :  { %304 = vmatprep.subr.mxu1 %v385_v0 }
  0x45   :  { %305 = vmatpush3.msra.mxu1 %v144_v19 }
  0xea   :  { %v139_v21 = vpop.f32.mrf.mxu0 }
  0xeb   :  { %v140_v22 = vadd.f32 %v244_v20, %v139_v21 }
  0xec   :  { %v273_v23 = vpop.f32.mrf.mxu0 }
  0xed   :  { %v143_v24 = vmax.f32 %v140_v22, 0.0 }
  0xef   :  { %307 = vmatmul.mubr.f32.vlgmr.msra.gmra.mxu1 %v143_v24 }
 0x1af   :  { %v233_v26 = vpop.f32.mrf.mxu1 }
 0x1b0   :  { %v234_v27 = vadd.f32 %v246_v25, %v233_v26 }
 0x1b1   :  { %v308_v28 = vpop.f32.mrf.mxu1 }
 0x1b2   :  { %237 = vst [vmem:[%s440_s5] sm:$0xff] %v234_v27 }
 0x1b3   :  { %242 = vsyncpa [#allocation3], 1 }
 0x1b4   :  { %243 = vsyncpa [#allocation5], 1 }

</bundles_post_ra>
